<compile_context>
chip_gen: v5e
topology: v5e:2x2
jax: 0.10.0
libtpu: 0.0.40
codegen_flags: <defaults>
</compile_context>

<pallas_src>
import math

import numpy as np
import jax
import jax.numpy as jnp
from jax.experimental import pallas as pl
from jax.experimental.pallas import tpu as pltpu


# ----------------------------------------------------------------------------
# Packed lane width: Lin must be a multiple of W (whole pixel rows per packed
# row) and of 32 (so 4*Lin is a multiple of 128 lanes -> unmasked stores).
# ----------------------------------------------------------------------------
def _pick_lin(W: int, R: int) -> int:
    l0 = (W * 32) // math.gcd(W, 32)          # lcm(W, 32)
    if l0 <= max(W, 256) and R % (l0 // W) == 0:
        return l0
    # Fallback: one pixel row per packed row.  Correct for any shape; output
    # stores may be lane-masked if 4*W is not a multiple of 128.
    return W


# ----------------------------------------------------------------------------
# Constant 0/1 block-diagonal expansion matrix E of shape (Lin, 4*Lin).
# Output column j (within a packed row) sources input lane
#   src(j) = (j // 4W) * W + ((j % 4W) % 2W) // 2
# i.e. G blocks of the base (W, 4W) nearest-2x expansion along the diagonal.
# ----------------------------------------------------------------------------
def _expand_matrix(W: int, lin: int, dtype) -> jnp.ndarray:
    cols = np.arange(4 * lin)
    g = cols // (4 * W)                        # which pixel row in the packed row
    p = cols % (4 * W)                         # position inside that row's 4W block
    src = g * W + (p % (2 * W)) // 2           # source lane in the packed input row
    e = (src[None, :] == np.arange(lin)[:, None])
    return jnp.asarray(e, dtype=dtype)


# ----------------------------------------------------------------------------
# Kernel:  o = x @ E  (one output element == exactly one input element).
#   native=True : x is bf16 -> single native MXU matmul (exact).
#   native=False: x is f32/f16 -> exact 3-way bf16 split, three bf16 matmuls
#                 accumulated in f32 (bit-exact for normal-range values).
# ----------------------------------------------------------------------------
def _make_kernel(native: bool):
    def kernel(x_ref, e_ref, o_ref):
        e = e_ref[...]
        if native:
            y = jnp.dot(x_ref[...], e, preferred_element_type=jnp.float32)
        else:
            x = x_ref[...].astype(jnp.float32)
            x1 = x.astype(jnp.bfloat16)                      # top 8 mantissa bits
            r1 = x - x1.astype(jnp.float32)                  # exact residual
            x2 = r1.astype(jnp.bfloat16)                     # next 8 bits
            x3 = (r1 - x2.astype(jnp.float32)).astype(jnp.bfloat16)  # remaining bits
            y = jnp.dot(x1, e, preferred_element_type=jnp.float32)
            y = y + jnp.dot(x2, e, preferred_element_type=jnp.float32)
            y = y + jnp.dot(x3, e, preferred_element_type=jnp.float32)
        o_ref[...] = y.astype(o_ref.dtype)
    return kernel


@jax.jit
def upsample_forward(x: jnp.ndarray) -> jnp.ndarray:
    """Nearest-exact 2x upsample of NCHW input: (B, C, H, W) -> (B, C, 2H, 2W)."""
    B, C, H, W = x.shape
    dtype = x.dtype
    if not jnp.issubdtype(dtype, jnp.floating):
        # TODO(synk): integer dtypes need a pure data-movement path (v7x MXU has
        # no integer mode); fall back to XLA's repeat for them.
        return jnp.repeat(jnp.repeat(x, 2, axis=2), 2, axis=3)

    R = B * C * H
    N = R * W
    lin = _pick_lin(W, R)
    rp = N // lin
    native = dtype == jnp.bfloat16
    passes = 1 if native else 3
    itemsize = jnp.dtype(dtype).itemsize

    e = _expand_matrix(W, lin, jnp.bfloat16)    # bf16: exact 0/1, half the VMEM
    xf = x.reshape(rp, lin)                     # free, contiguous reshape

    # Row-tile sizing: as big as a conservative VMEM budget allows (amortizes
    # the ~0.35us/grid-step overhead), grid = cdiv handles any remainder.
    e_bytes = 2 * e.size * 2                                # double-buffered bf16 E
    per_row = 2 * 5 * lin * itemsize + 2 * 4 * lin * 4      # 2x(in+out) + f32 temps
    budget = 24 * 1024 * 1024
    rt = max(8, ((budget - e_bytes) // per_row) // 8 * 8)
    if rt >= rp:
        rt, grid = rp, (1,)
    else:
        grid = (pl.cdiv(rp, rt),)

    out2 = pl.pallas_call(
        _make_kernel(native),
        out_shape=jax.ShapeDtypeStruct((rp, 4 * lin), dtype),
        grid=grid,
        in_specs=[
            pl.BlockSpec((rt, lin), lambda i: (i, 0)),
            pl.BlockSpec((lin, 4 * lin), lambda i: (0, 0)),  # constant block: DMA'd once
        ],
        out_specs=pl.BlockSpec((rt, 4 * lin), lambda i: (i, 0)),
        compiler_params=pltpu.CompilerParams(
            dimension_semantics=("parallel",),
            vmem_limit_bytes=32 * 1024 * 1024),
        cost_estimate=pl.CostEstimate(
            flops=passes * 2 * rp * lin * 4 * lin,
            transcendentals=0,
            bytes_accessed=5 * N * itemsize + e.size * 2),
    )(xf, e)

    # (Rp, 4*Lin) is bit-identical in memory to (B, C, 2H, 2W): free reshape.
    return out2.reshape(B, C, 2 * H, 2 * W)


# ----------------------------------------------------------------------------
# Pure-JAX reference (nearest-exact with integer scale 2 == pixel repeat).
# ----------------------------------------------------------------------------
def upsample_reference(x: jnp.ndarray) -> jnp.ndarray:
    return jnp.repeat(jnp.repeat(x, 2, axis=2), 2, axis=3)


if __name__ == "__main__":
    B, C, H, W = 2, 4, 16, 16
    key = jax.random.PRNGKey(0)

    # float32 (split-matmul path)
    x = jax.random.normal(key, (B, C, H, W), dtype=jnp.float32)
    out = jax.block_until_ready(upsample_forward(x))
    ref = upsample_reference(x)
    assert out.shape == (B, C, 2 * H, 2 * W)
    assert out.dtype == x.dtype
    np.testing.assert_allclose(np.asarray(out), np.asarray(ref), rtol=0, atol=1e-6)

    # bfloat16 (native MXU path)
    xb = x.astype(jnp.bfloat16)
    outb = jax.block_until_ready(upsample_forward(xb))
    refb = upsample_reference(xb)
    assert outb.dtype == jnp.bfloat16
    np.testing.assert_allclose(np.asarray(outb.astype(jnp.float32)),
                               np.asarray(refb.astype(jnp.float32)),
                               rtol=0, atol=0)

    print("KERNEL_OK")
</pallas_src>

<mosaic_0001>
module attributes {stable_mosaic.version = 11 : i64} {
  func.func @kernel(%arg0: i32, %arg1: memref<64x32xf32, #tpu.memory_space<vmem>>, %arg2: memref<32x128xbf16, #tpu.memory_space<vmem>>, %arg3: memref<64x128xf32, #tpu.memory_space<vmem>>) attributes {dimension_semantics = [#tpu.dimension_semantics<parallel>], iteration_bounds = array<i64: 1>, scalar_prefetch = 0 : i64, scratch_operands = 0 : i64, tpu.core_type = #tpu.core_type<tc>, window_params = [{transform_indices = @transform_0, window_bounds = array<i64: 64, 32>}, {pipeline_mode = #tpu.pipeline_mode<synchronous>, transform_indices = @transform_1, window_bounds = array<i64: 32, 128>}, {transform_indices = @transform_2, window_bounds = array<i64: 64, 128>}]} {
    %c0 = arith.constant 0 : index
    %c0_0 = arith.constant 0 : index
    %0 = vector.load %arg2[%c0, %c0_0] : memref<32x128xbf16, #tpu.memory_space<vmem>>, vector<32x128xbf16>
    %c0_1 = arith.constant 0 : index
    %c0_2 = arith.constant 0 : index
    %1 = vector.load %arg1[%c0_1, %c0_2] : memref<64x32xf32, #tpu.memory_space<vmem>>, vector<64x32xf32>
    %2 = arith.truncf %1 : vector<64x32xf32> to vector<64x32xbf16>
    %3 = arith.extf %2 : vector<64x32xbf16> to vector<64x32xf32>
    %4 = arith.subf %1, %3 : vector<64x32xf32>
    %5 = arith.truncf %4 : vector<64x32xf32> to vector<64x32xbf16>
    %6 = arith.extf %5 : vector<64x32xbf16> to vector<64x32xf32>
    %7 = arith.subf %4, %6 : vector<64x32xf32>
    %8 = arith.truncf %7 : vector<64x32xf32> to vector<64x32xbf16>
    %cst = arith.constant dense<0.000000e+00> : vector<64x128xf32>
    %9 = tpu.matmul %2, %0, %cst {dimension_numbers = #tpu.dot_dimension_numbers<[1], [0], [0], [1], [0, 0, 1, 1], [], []>} : vector<64x32xbf16>, vector<32x128xbf16>, vector<64x128xf32> -> vector<64x128xf32>
    %cst_3 = arith.constant dense<0.000000e+00> : vector<64x128xf32>
    %10 = tpu.matmul %5, %0, %cst_3 {dimension_numbers = #tpu.dot_dimension_numbers<[1], [0], [0], [1], [0, 0, 1, 1], [], []>} : vector<64x32xbf16>, vector<32x128xbf16>, vector<64x128xf32> -> vector<64x128xf32>
    %11 = arith.addf %9, %10 : vector<64x128xf32>
    %cst_4 = arith.constant dense<0.000000e+00> : vector<64x128xf32>
    %12 = tpu.matmul %8, %0, %cst_4 {dimension_numbers = #tpu.dot_dimension_numbers<[1], [0], [0], [1], [0, 0, 1, 1], [], []>} : vector<64x32xbf16>, vector<32x128xbf16>, vector<64x128xf32> -> vector<64x128xf32>
    %13 = arith.addf %11, %12 : vector<64x128xf32>
    %c0_5 = arith.constant 0 : index
    %c0_6 = arith.constant 0 : index
    %14 = vector.load %arg3[%c0_5, %c0_6] : memref<64x128xf32, #tpu.memory_space<vmem>>, vector<64x128xf32>
    tpu.vector_store %arg3[%c0_5, %c0_6], %13 {strides = array<i32>} : memref<64x128xf32, #tpu.memory_space<vmem>>, vector<64x128xf32>,
    return
  }
  func.func @transform_0(%arg0: i32) -> (i32, i32) {
    %c0_i32 = arith.constant 0 : i32
    %c0_i32_0 = arith.constant 0 : i32
    return %arg0, %c0_i32 : i32, i32
  }
  func.func @transform_1(%arg0: i32) -> (i32, i32) {
    %c0_i32 = arith.constant 0 : i32
    %c0_i32_0 = arith.constant 0 : i32
    %c0_i32_1 = arith.constant 0 : i32
    return %c0_i32, %c0_i32_0 : i32, i32
  }
  func.func @transform_2(%arg0: i32) -> (i32, i32) {
    %c0_i32 = arith.constant 0 : i32
    %c0_i32_0 = arith.constant 0 : i32
    return %arg0, %c0_i32 : i32, i32
  }
}

</mosaic_0001>

<bundles_post_ra>
// kernel: upsample_forward.1
= control target key start
LH: loop header
LB: loop body
LE: loop exit
PB: predicated region body
PF: predicated region fallthrough
CT: control target
= control target key end

     0   :  { %vm108_vm0 = vcmask 261120   ;;  %s407_s1 = inlined_call_operand.vmem [shape: bf16[32,128], index: 1, kind: input, shape index: {}]   ;;  %s408_s0 = inlined_call_operand.vmem [shape: f32[64,32], index: 0, kind: input, shape index: {}]   ;;  %s409_s2 = inlined_call_operand.vmem [shape: f32[64,128], index: 2, kind: output, shape index: {}]  }
   0x1   :  { %v293_v0 = vld [vmem:[%s407_s1 + $0x8] sm:$0xff]  ;;  %v18_v1 = vld [vmem:[%s408_s0 + $0x10] sm:$0xff]  ;;  %v19_v2 = vld [vmem:[%s408_s0 + $0x18] sm:$0xff] }
   0x2   :  { %v26_v3 = vpack.c.bf16 %v18_v1, %v18_v1  ;;  %v16_v4 = vld [vmem:[%s408_s0] sm:$0xff]  ;;  %v17_v5 = vld [vmem:[%s408_s0 + $0x8] sm:$0xff]  ;;  %296 = vmatpush.bf16.msra.mxu1 %v293_v0  ;;  %127 = vmatpush.bf16.msra.mxu0 %v293_v0  ;;  %v27_v7 = vpack.c.bf16 %v19_v2, %v19_v2  ;;  %v22_v48 = vld [vmem:[%s408_s0 + $0x30] sm:$0xff] }
   0x3   :  { %v292_v6 = vld [vmem:[%s407_s1] sm:$0xff]  ;;  %v333_v8 = vpack.c.bf16 %v16_v4, %v16_v4  ;;  %v335_v9 = vpack.c.bf16 %v17_v5, %v17_v5  ;;  %v21_v11 = vld [vmem:[%s408_s0 + $0x28] sm:$0xff]  ;;  %294 = vmatpush.bf16.msra.mxu3 %v293_v0  ;;  %298 = vmatpush.bf16.msra.mxu2 %v293_v0  ;;  %v23_v49 = vld [vmem:[%s408_s0 + $0x38] sm:$0xff]  ;;  %v30_v53 = vpack.c.bf16 %v22_v48, %v22_v48 }
   0x4   :  { %v20_v10 = vld [vmem:[%s408_s0 + $0x20] sm:$0xff]  ;;  %v34_v12 = vunpack.c.l.bf16 %v26_v3  ;;  %v160_v13 = vunpack.c.l.b16 %v26_v3  ;;  %v35_v15 = vunpack.c.l.bf16 %v27_v7  ;;  %v161_v16 = vunpack.c.l.b16 %v27_v7 }
   0x5   :  { %v28_v14 = vpack.c.bf16 %v20_v10, %v20_v10  ;;  %v32_v17 = vunpack.c.l.bf16 %v333_v8  ;;  %v33_v18 = vunpack.c.l.bf16 %v335_v9  ;;  %v29_v20 = vpack.c.bf16 %v21_v11, %v21_v11 }
   0x6   :  { %v42_v19 = vsub.f32 %v18_v1, %v34_v12  ;;  %297 = vmatpush.bf16.msra.mxu1 %v292_v6  ;;  %128 = vmatpush.bf16.msra.mxu0 %v292_v6  ;;  %v167_v21 = vpack.c.b16 %v161_v16, %v160_v13  ;;  %v43_v24 = vsub.f32 %v19_v2, %v35_v15  ;;  %v158_v55 = vunpack.c.l.b16 %v333_v8 }
   0x7   :  { %v345_v22 = vsub.f32 %v16_v4, %v32_v17  ;;  %v347_v23 = vsub.f32 %v17_v5, %v33_v18  ;;  %295 = vmatpush.bf16.msra.mxu3 %v292_v6  ;;  %299 = vmatpush.bf16.msra.mxu2 %v292_v6  ;;  %v36_v28 = vunpack.c.l.bf16 %v28_v14  ;;  %v37_v32 = vunpack.c.l.bf16 %v29_v20 }
   0x8   :  { %v50_v25 = vpack.c.bf16 %v42_v19, %v42_v19  ;;  %v51_v29 = vpack.c.bf16 %v43_v24, %v43_v24  ;;  %v162_v44 = vunpack.c.l.b16 %v28_v14  ;;  %v163_v45 = vunpack.c.l.b16 %v29_v20 }
   0x9   :  { %v351_v26 = vpack.c.bf16 %v345_v22, %v345_v22  ;;  %v355_v27 = vpack.c.bf16 %v347_v23, %v347_v23  ;;  %285 = vmatmul.msk.bf16.vlgmr.msra.gmra.mxu1 %vm108_vm0, %v167_v21  ;;  %v44_v41 = vsub.f32 %v20_v10, %v36_v28  ;;  %v45_v42 = vsub.f32 %v21_v11, %v37_v32 }
   0xa   :  { %188 = vmatpush.bf16.msrb.mxu0 %v293_v0  ;;  %v86_v30 = vunpack.c.l.b16 %v50_v25  ;;  %v58_v31 = vunpack.c.l.bf16 %v50_v25  ;;  %v87_v35 = vunpack.c.l.b16 %v51_v29  ;;  %v59_v36 = vunpack.c.l.bf16 %v51_v29 }
   0xb   :  { %v84_v33 = vunpack.c.l.b16 %v351_v26  ;;  %v85_v34 = vunpack.c.l.b16 %v355_v27  ;;  %v52_v46 = vpack.c.bf16 %v44_v41, %v44_v41  ;;  %v53_v47 = vpack.c.bf16 %v45_v42, %v45_v42 }
   0xc   :  { %v66_v37 = vsub.f32 %v42_v19, %v58_v31  ;;  %v93_v39 = vpack.c.b16 %v87_v35, %v86_v30  ;;  %v67_v40 = vsub.f32 %v43_v24, %v59_v36  ;;  %v168_v50 = vpack.c.b16 %v163_v45, %v162_v44 }
   0xd   :  { %v92_v38 = vpack.c.b16 %v85_v34, %v84_v33  ;;  %v60_v51 = vunpack.c.l.bf16 %v52_v46  ;;  %v61_v52 = vunpack.c.l.bf16 %v53_v47  ;;  %v31_v54 = vpack.c.bf16 %v23_v49, %v23_v49 }
   0xe   :  { %189 = vmatpush.bf16.msrb.mxu0 %v292_v6  ;;  %281 = vmatmul.msk.bf16.vlgmr.msra.gmra.mxu3 %vm108_vm0, %v93_v39  ;;  %v73_v43 = vpack.c.bf16 %v67_v40, %v66_v37  ;;  %v159_v56 = vunpack.c.l.b16 %v335_v9  ;;  %v88_v57 = vunpack.c.l.b16 %v52_v46  ;;  %v89_v58 = vunpack.c.l.b16 %v53_v47 }
   0xf   :  { %280 = vmatmul.msk.bf16.vlgmr.msra.gmra.mxu0 %vm108_vm0, %v92_v38  ;;  %v68_v59 = vsub.f32 %v44_v41, %v60_v51  ;;  %v69_v60 = vsub.f32 %v45_v42, %v61_v52  ;;  %v38_v61 = vunpack.c.l.bf16 %v30_v53  ;;  %v39_v62 = vunpack.c.l.bf16 %v31_v54 }
  0x10   :  { %289 = vmatmul.msk.bf16.vlgmr.msra.gmra.mxu2 %vm108_vm0, %v73_v43  ;;  %v166_v63 = vpack.c.b16 %v159_v56, %v158_v55  ;;  %v164_v4 = vunpack.c.l.b16 %v30_v53  ;;  %v165_v5 = vunpack.c.l.b16 %v31_v54  ;;  %v56_v8 = vunpack.c.l.bf16 %v351_v26 }
  0x11   :  { %v74_v1 = vpack.c.bf16 %v69_v60, %v68_v59  ;;  %v46_v2 = vsub.f32 %v22_v48, %v38_v61  ;;  %v47_v3 = vsub.f32 %v23_v49, %v39_v62  ;;  %v57_v9 = vunpack.c.l.bf16 %v355_v27 }
  0x12   :  { %229 = vmatpush.bf16.msra.mxu0 %v293_v0  ;;  %v94_v0 = vpack.c.b16 %v89_v58, %v88_v57  ;;  %v169_v10 = vpack.c.b16 %v165_v5, %v164_v4  ;;  %v64_v13 = vsub.f32 %v345_v22, %v56_v8 }
  0x13   :  { %v55_v7 = vpack.c.bf16 %v47_v3, %v47_v3  ;;  %v65_v14 = vsub.f32 %v347_v23, %v57_v9 }
  0x15   :  { %v63_v12 = vunpack.c.l.bf16 %v55_v7  ;;  %v91_v16 = vunpack.c.l.b16 %v55_v7  ;;  %v72_v19 = vpack.c.bf16 %v65_v14, %v64_v13 }
  0x16   :  { %230 = vmatpush.bf16.msra.mxu0 %v292_v6  ;;  %v54_v6 = vpack.c.bf16 %v46_v2, %v46_v2 }
  0x17   :  { %v71_v18 = vsub.f32 %v47_v3, %v63_v12 }
  0x18   :  { %v62_v11 = vunpack.c.l.bf16 %v54_v6  ;;  %v90_v15 = vunpack.c.l.b16 %v54_v6 }
  0x19   :  { %286 = vmatmul.msk.bf16.gmra.mxu1 %vm108_vm0, %v168_v50 }
  0x1a   :  { %v70_v17 = vsub.f32 %v46_v2, %v62_v11  ;;  %v95_v20 = vpack.c.b16 %v91_v16, %v90_v15 }
  0x1c   :  { %v75_v21 = vpack.c.bf16 %v71_v18, %v70_v17 }
  0x1e   :  { %282 = vmatmul.msk.bf16.gmra.mxu3 %vm108_vm0, %v94_v0 }
  0x1f   :  { %284 = vmatmul.msk.bf16.vlgmr.msrb.gmra.mxu0 %vm108_vm0, %v166_v63 }
  0x20   :  { %290 = vmatmul.msk.bf16.gmra.mxu2 %vm108_vm0, %v74_v1 }
  0x29   :  { %287 = vmatmul.msk.bf16.gmra.mxu1 %vm108_vm0, %v169_v10 }
  0x2e   :  { %283 = vmatmul.msk.bf16.gmra.mxu3 %vm108_vm0, %v95_v20 }
  0x2f   :  { %288 = vmatmul.msk.bf16.vlgmr.msra.gmra.mxu0 %vm108_vm0, %v72_v19 }
  0x30   :  { %291 = vmatmul.msk.bf16.gmra.mxu2 %vm108_vm0, %v75_v21 }
  0x86   :  { %v196_v24 = vpop.f32.mrf.mxu1 }
  0x8c   :  { %v130_v25 = vpop.f32.mrf.mxu0 }
  0x8e   :  { %v198_v26 = vpop.f32.mrf.mxu1 }
  0x91   :  { %v135_v22 = vpop.f32.mrf.mxu3 }
  0x92   :  { %v197_v23 = vadd.f32 %v196_v24, %v135_v22 }
  0x93   :  { %v237_v28 = vpop.f32.mrf.mxu2 }
  0x94   :  { %v132_v27 = vpop.f32.mrf.mxu0  ;;  %v254_v29 = vadd.f32 %v237_v28, %v197_v23 }
  0x96   :  { %262 = vst [vmem:[%s409_s2 + $0x10] sm:$0xff] %v254_v29  ;;  %v201_v33 = vpop.f32.mrf.mxu1 }
  0x99   :  { %v137_v30 = vpop.f32.mrf.mxu3 }
  0x9a   :  { %v199_v31 = vadd.f32 %v198_v26, %v137_v30 }
  0x9b   :  { %v239_v34 = vpop.f32.mrf.mxu2 }
  0x9c   :  { %v191_v32 = vpop.f32.mrf.mxu0  ;;  %v255_v35 = vadd.f32 %v239_v34, %v199_v31 }
  0x9d   :  { %v192_v42 = vadd.f32 %v191_v32, %v130_v25 }
  0x9e   :  { %263 = vst [vmem:[%s409_s2 + $0x18] sm:$0xff] %v255_v35  ;;  %v203_v41 = vpop.f32.mrf.mxu1 }
  0xa1   :  { %v140_v36 = vpop.f32.mrf.mxu3 }
  0xa2   :  { %v202_v37 = vadd.f32 %v201_v33, %v140_v36 }
  0xa3   :  { %v242_v39 = vpop.f32.mrf.mxu2 }
  0xa4   :  { %v193_v38 = vpop.f32.mrf.mxu0  ;;  %v256_v40 = vadd.f32 %v242_v39, %v202_v37 }
  0xa5   :  { %v194_v50 = vadd.f32 %v193_v38, %v132_v27 }
  0xa6   :  { %264 = vst [vmem:[%s409_s2 + $0x20] sm:$0xff] %v256_v40  ;;  %v206_v49 = vpop.f32.mrf.mxu1 }
  0xa9   :  { %v142_v43 = vpop.f32.mrf.mxu3 }
  0xaa   :  { %v204_v44 = vadd.f32 %v203_v41, %v142_v43 }
  0xab   :  { %v244_v47 = vpop.f32.mrf.mxu2 }
  0xac   :  { %v232_v45 = vpop.f32.mrf.mxu0  ;;  %v257_v48 = vadd.f32 %v244_v47, %v204_v44 }
  0xad   :  { %v252_v46 = vadd.f32 %v232_v45, %v192_v42 }
  0xae   :  { %265 = vst [vmem:[%s409_s2 + $0x28] sm:$0xff] %v257_v48  ;;  %v208_v57 = vpop.f32.mrf.mxu1 }
  0xaf   :  { %260 = vst [vmem:[%s409_s2] sm:$0xff] %v252_v46 }
  0xb1   :  { %v145_v51 = vpop.f32.mrf.mxu3 }
  0xb2   :  { %v207_v52 = vadd.f32 %v206_v49, %v145_v51 }
  0xb3   :  { %v247_v55 = vpop.f32.mrf.mxu2 }
  0xb4   :  { %v234_v53 = vpop.f32.mrf.mxu0  ;;  %v258_v56 = vadd.f32 %v247_v55, %v207_v52 }
  0xb5   :  { %v253_v54 = vadd.f32 %v234_v53, %v194_v50 }
  0xb6   :  { %266 = vst [vmem:[%s409_s2 + $0x30] sm:$0xff] %v258_v56 }
  0xb7   :  { %261 = vst [vmem:[%s409_s2 + $0x8] sm:$0xff] %v253_v54 }
  0xb9   :  { %v147_v58 = vpop.f32.mrf.mxu3 }
  0xba   :  { %v209_v59 = vadd.f32 %v208_v57, %v147_v58 }
  0xbb   :  { %v249_v60 = vpop.f32.mrf.mxu2 }
  0xbc   :  { %v259_v61 = vadd.f32 %v249_v60, %v209_v59 }
  0xbe   :  { %267 = vst [vmem:[%s409_s2 + $0x38] sm:$0xff] %v259_v61 }

</bundles_post_ra>
